<compile_context>
chip_gen: v6e
topology: v6e:2x2x1
jax: 0.10.0
libtpu: 0.0.40
codegen_flags: <defaults>
</compile_context>

<pallas_src>
import jax
import jax.numpy as jnp
from jax.experimental import pallas as pl
from jax.experimental.pallas import tpu as pltpu

MASK_VALUE = -1e9        # repo constant MASK_VALUE (large negative fill)
SMOOTH_FACTOR = 1e-7     # compute_smooth_sigmoid smooth_factor


def _retrieval_score_kernel(
    doc_emb_ref, sent_emb_ref, doc_lens_ref, sent_lens_ref, d2s_ref,
    w1_ref, b1_ref, w2_ref, bias2_ref,
    doc_out_ref, sent_out_ref,
):
  Bt, Nd, H = doc_emb_ref.shape
  Ns = sent_emb_ref.shape[1]
  H4 = w2_ref.shape[1]
  nd_rows = Bt * Nd
  ns_rows = Bt * Ns

  # ---- fused first layer (doc + sent) on the MXU, bf16 in / f32 accumulate ----
  xd = doc_emb_ref[...].reshape(nd_rows, H)                     # (Bt*Nd, H) bf16
  xs = sent_emb_ref[...].reshape(ns_rows, H)                    # (Bt*Ns, H) bf16
  x = jnp.concatenate([xd, xs], axis=0)                         # (rows, H) bf16

  h = jnp.dot(x, w1_ref[...], preferred_element_type=jnp.float32)   # (rows, 8H) f32
  h = jnp.maximum(h + b1_ref[...], 0.0)                         # relu (extra halves are free filler)

  hd = h[:nd_rows, :H4].reshape(Bt, Nd, H4)                     # doc hidden
  hs = h[nd_rows:, H4:].reshape(Bt, Ns, H4)                     # sent hidden

  # ---- second layer: VPU multiply + lane reduce (no N=1 matmul) ----
  w2d = w2_ref[0:1, :]                                          # (1, 4H)
  w2s = w2_ref[1:2, :]                                          # (1, 4H)
  b2d = bias2_ref[0]
  b2s = bias2_ref[1]
  doc_score = jnp.sum(hd * w2d, axis=-1) + b2d                  # (Bt, Nd)
  sent_score = jnp.sum(hs * w2s, axis=-1) + b2s                 # (Bt, Ns)

  doc_lens = doc_lens_ref[...]                                  # (Bt, Nd) int32
  sent_lens = sent_lens_ref[...]                                # (Bt, Ns) int32
  d2s_map = d2s_ref[...]                                        # (Bt, Ns) int32

  # ---- hierarchical_score ----
  # doc_scores.masked_fill(doc_lens == 0, MASK_VALUE)
  doc_masked = jnp.where(doc_lens == 0, MASK_VALUE, doc_score)  # (Bt, Nd)

  # softmax over docs (lane reduce)
  m = jnp.max(doc_masked, axis=-1, keepdims=True)
  e = jnp.exp(doc_masked - m)
  doc_attn = e / jnp.sum(e, axis=-1, keepdims=True)             # (Bt, Nd)

  # compute_smooth_sigmoid
  p = 1.0 / (1.0 + jnp.exp(-sent_score))
  p = jnp.clip(p, SMOOTH_FACTOR, 1.0 - SMOOTH_FACTOR)           # (Bt, Ns)

  # doc2sent_attn[b, s] = doc_attn[b, doc2sent_map[b, s]]  (select + reduce, VPU/XLU)
  doc_iota = jax.lax.broadcasted_iota(jnp.int32, (Bt, Ns, Nd), 2)
  onehot = doc_iota == d2s_map[:, :, None]                      # (Bt, Ns, Nd)
  d2s_attn = jnp.sum(jnp.where(onehot, doc_attn[:, None, :], 0.0), axis=-1)  # (Bt, Ns)

  p = p * d2s_attn
  # compute_smooth_reverse_sigmoid
  rev = jnp.log(p / (1.0 - p))
  rev = jnp.where(sent_lens == 0, MASK_VALUE, rev)              # (Bt, Ns)

  doc_out_ref[...] = doc_masked
  sent_out_ref[...] = rev


def longformer_retrieval_scores(sequence_output, doc_start, sent_end,
                                doc_lens, sent_lens, doc2sent_map, params,
                                batch_tile=None):
  """score_computation (graph_training path) of LongformerRetrievalModel.

  sequence_output: (B, S, H) float32 — Longformer encoder output (synthetic).
  Returns (doc_scores (B, Nd), sent_scores (B, Ns)).
  """
  B, S, H = sequence_output.shape
  Nd = doc_start.shape[1]
  Ns = sent_end.shape[1]

  if batch_tile is None:
    # Fold batches until the fused matmul sees ~up to 512 rows per grid step.
    rows_per_b = Nd + Ns
    batch_tile = 1
    for bt in range(1, B + 1):
      if B % bt == 0 and bt * rows_per_b <= 512:
        batch_tile = bt
  assert B % batch_tile == 0, "batch must be divisible by batch_tile"
  Bt = batch_tile
  grid = (B // Bt,)

  # Embedding gathers (glue, plain JAX — mirrors the fancy-index gather in torch).
  # Cast to bf16 before the gather: halves gather bandwidth + kernel DMA bytes.
  seq_bf16 = sequence_output.astype(jnp.bfloat16)
  bidx = jnp.arange(B)[:, None]
  doc_embed = seq_bf16[bidx, doc_start]                         # (B, Nd, H) bf16
  sent_embed = seq_bf16[bidx, sent_end]                         # (B, Ns, H) bf16

  dl = doc_lens.astype(jnp.int32)                               # (B, Nd)
  sl = sent_lens.astype(jnp.int32)                              # (B, Ns)
  dm = doc2sent_map.astype(jnp.int32)                           # (B, Ns)

  # Fused / packed parameters.
  # NOTE(v7x): at real Longformer H (768-1024) keep w1 in bf16 so the resident
  # weights fit v7x's 64 MiB VMEM; tile the 4H contraction if still tight.
  w1_cat = jnp.concatenate([params["w1d"], params["w1s"]], axis=1).astype(jnp.bfloat16)   # (H, 8H)
  b1_cat = jnp.concatenate([params["b1d"], params["b1s"]], axis=1).astype(jnp.float32)    # (1, 8H)
  w2_cat = jnp.concatenate([params["w2d"], params["w2s"]], axis=0).astype(jnp.float32)    # (2, 4H)
  bias2 = jnp.concatenate(
      [params["b2d"].reshape(-1), params["b2s"].reshape(-1)]).astype(jnp.float32)         # (2,) SMEM

  in_specs = [
      pl.BlockSpec((Bt, Nd, H), lambda b: (b, 0, 0)),           # doc_embed
      pl.BlockSpec((Bt, Ns, H), lambda b: (b, 0, 0)),           # sent_embed
      pl.BlockSpec((Bt, Nd), lambda b: (b, 0)),                 # doc_lens
      pl.BlockSpec((Bt, Ns), lambda b: (b, 0)),                 # sent_lens
      pl.BlockSpec((Bt, Ns), lambda b: (b, 0)),                 # doc2sent_map
      pl.BlockSpec((H, 8 * H), lambda b: (0, 0)),               # w1_cat (resident)
      pl.BlockSpec((1, 8 * H), lambda b: (0, 0)),               # b1_cat
      pl.BlockSpec((2, 4 * H), lambda b: (0, 0)),               # w2_cat
      pl.BlockSpec(memory_space=pltpu.MemorySpace.SMEM),        # bias2 scalars
  ]
  out_specs = (
      pl.BlockSpec((Bt, Nd), lambda b: (b, 0)),
      pl.BlockSpec((Bt, Ns), lambda b: (b, 0)),
  )
  out_shapes = (
      jax.ShapeDtypeStruct((B, Nd), jnp.float32),
      jax.ShapeDtypeStruct((B, Ns), jnp.float32),
  )

  doc_s, sent_s = pl.pallas_call(
      _retrieval_score_kernel,
      out_shape=out_shapes,
      grid=grid,
      in_specs=in_specs,
      out_specs=out_specs,
      compiler_params=pltpu.CompilerParams(
          dimension_semantics=("parallel",),
          vmem_limit_bytes=64 * 1024 * 1024),
  )(doc_embed, sent_embed, dl, sl, dm, w1_cat, b1_cat, w2_cat, bias2)

  return doc_s, sent_s


# ---------------- pure-JAX reference (for verification) ----------------
def _reference(sequence_output, doc_start, sent_end, doc_lens, sent_lens,
               doc2sent_map, params):
  B = sequence_output.shape[0]
  bidx = jnp.arange(B)[:, None]
  seq_bf16 = sequence_output.astype(jnp.bfloat16)
  doc_embed = seq_bf16[bidx, doc_start]
  sent_embed = seq_bf16[bidx, sent_end]

  def mlp(x, w1, b1, w2, b2):
    h = jnp.dot(x, w1.astype(jnp.bfloat16), preferred_element_type=jnp.float32)
    h = jnp.maximum(h + b1, 0.0)
    return jnp.sum(h * w2, axis=-1) + b2[0, 0]

  doc_score = mlp(doc_embed, params["w1d"], params["b1d"],
                  params["w2d"], params["b2d"])                 # (B, Nd)
  sent_score = mlp(sent_embed, params["w1s"], params["b1s"],
                   params["w2s"], params["b2s"])                # (B, Ns)

  doc_masked = jnp.where(doc_lens == 0, MASK_VALUE, doc_score)
  doc_attn = jax.nn.softmax(doc_masked, axis=-1)
  p = jnp.clip(jax.nn.sigmoid(sent_score), SMOOTH_FACTOR, 1.0 - SMOOTH_FACTOR)
  d2s_attn = jnp.take_along_axis(doc_attn, doc2sent_map, axis=-1)
  p = p * d2s_attn
  rev = jnp.log(p / (1.0 - p))
  rev = jnp.where(sent_lens == 0, MASK_VALUE, rev)
  return doc_masked, rev


if __name__ == "__main__":
  key = jax.random.PRNGKey(0)
  B, S, H = 2, 64, 128          # batch, seq len, hidden_size
  Nd, Ns = 8, 16                # num docs, num sentences

  ks = jax.random.split(key, 12)
  # synthetic Longformer sequence_output  (layout: (batch, seq, hidden))
  seq_out = jax.random.normal(ks[0], (B, S, H), dtype=jnp.float32)

  doc_start = jax.random.randint(ks[1], (B, Nd), 0, S)
  sent_end = jax.random.randint(ks[2], (B, Ns), 0, S)
  doc_lens = jax.random.randint(ks[3], (B, Nd), 0, 3)    # zeros => masked docs
  sent_lens = jax.random.randint(ks[4], (B, Ns), 0, 3)   # zeros => masked sents
  doc2sent_map = jax.random.randint(ks[5], (B, Ns), 0, Nd)

  # MLP(d_input=H, d_mid=4H, d_out=1) parameters, deterministic init.
  # (Weights stored (in, out); PyTorch stores (out, in) and transposes — same math.)
  scale = 0.02
  params = {
      "w1d": scale * jax.random.normal(ks[6], (H, 4 * H), jnp.float32),
      "b1d": jnp.zeros((1, 4 * H), jnp.float32),
      "w2d": scale * jax.random.normal(ks[7], (1, 4 * H), jnp.float32),
      "b2d": jnp.zeros((1, 1), jnp.float32),
      "w1s": scale * jax.random.normal(ks[8], (H, 4 * H), jnp.float32),
      "b1s": jnp.zeros((1, 4 * H), jnp.float32),
      "w2s": scale * jax.random.normal(ks[9], (1, 4 * H), jnp.float32),
      "b2s": jnp.zeros((1, 1), jnp.float32),
  }

  doc_scores, sent_scores = longformer_retrieval_scores(
      seq_out, doc_start, sent_end, doc_lens, sent_lens, doc2sent_map, params)
  jax.block_until_ready((doc_scores, sent_scores))

  ref_doc, ref_sent = _reference(
      seq_out, doc_start, sent_end, doc_lens, sent_lens, doc2sent_map, params)

  assert doc_scores.shape == (B, Nd) and sent_scores.shape == (B, Ns)
  assert jnp.allclose(doc_scores, ref_doc, rtol=1e-3, atol=1e-3), "doc mismatch"
  assert jnp.allclose(sent_scores, ref_sent, rtol=1e-3, atol=1e-3), "sent mismatch"
  print("KERNEL_OK")
</pallas_src>

<mosaic_0001>
module attributes {stable_mosaic.version = 11 : i64} {
  func.func @_retrieval_score_kernel(%arg0: i32, %arg1: memref<2x8x128xbf16, #tpu.memory_space<vmem>>, %arg2: memref<2x16x128xbf16, #tpu.memory_space<vmem>>, %arg3: memref<2x8xi32, #tpu.memory_space<vmem>>, %arg4: memref<2x16xi32, #tpu.memory_space<vmem>>, %arg5: memref<2x16xi32, #tpu.memory_space<vmem>>, %arg6: memref<128x1024xbf16, #tpu.memory_space<vmem>>, %arg7: memref<1x1024xf32, #tpu.memory_space<vmem>>, %arg8: memref<2x512xf32, #tpu.memory_space<vmem>>, %arg9: memref<2xf32, #tpu.memory_space<smem>>, %arg10: memref<2x8xf32, #tpu.memory_space<vmem>>, %arg11: memref<2x16xf32, #tpu.memory_space<vmem>>) attributes {dimension_semantics = [#tpu.dimension_semantics<parallel>], iteration_bounds = array<i64: 1>, scalar_prefetch = 0 : i64, scratch_operands = 0 : i64, tpu.core_type = #tpu.core_type<tc>, window_params = [{transform_indices = @transform_0, window_bounds = array<i64: 2, 8, 128>}, {transform_indices = @transform_1, window_bounds = array<i64: 2, 16, 128>}, {transform_indices = @transform_2, window_bounds = array<i64: 2, 8>}, {transform_indices = @transform_3, window_bounds = array<i64: 2, 16>}, {transform_indices = @transform_4, window_bounds = array<i64: 2, 16>}, {pipeline_mode = #tpu.pipeline_mode<synchronous>, transform_indices = @transform_5, window_bounds = array<i64: 128, 1024>}, {pipeline_mode = #tpu.pipeline_mode<synchronous>, transform_indices = @transform_6, window_bounds = array<i64: 1, 1024>}, {pipeline_mode = #tpu.pipeline_mode<synchronous>, transform_indices = @transform_7, window_bounds = array<i64: 2, 512>}, {transform_indices = @transform_8, window_bounds = array<i64: 2>}, {transform_indices = @transform_9, window_bounds = array<i64: 2, 8>}, {transform_indices = @transform_10, window_bounds = array<i64: 2, 16>}]} {
    %c0 = arith.constant 0 : index
    %c0_0 = arith.constant 0 : index
    %c0_1 = arith.constant 0 : index
    %0 = vector.load %arg1[%c0, %c0_0, %c0_1] : memref<2x8x128xbf16, #tpu.memory_space<vmem>>, vector<2x8x128xbf16>
    %1 = vector.shape_cast %0 : vector<2x8x128xbf16> to vector<16x128xbf16>
    %c0_2 = arith.constant 0 : index
    %c0_3 = arith.constant 0 : index
    %c0_4 = arith.constant 0 : index
    %2 = vector.load %arg2[%c0_2, %c0_3, %c0_4] : memref<2x16x128xbf16, #tpu.memory_space<vmem>>, vector<2x16x128xbf16>
    %3 = vector.shape_cast %2 : vector<2x16x128xbf16> to vector<32x128xbf16>
    %4 = tpu.concatenate %1, %3 in 0 : vector<16x128xbf16>, vector<32x128xbf16> -> vector<48x128xbf16>
    %c0_5 = arith.constant 0 : index
    %c0_6 = arith.constant 0 : index
    %5 = vector.load %arg6[%c0_5, %c0_6] : memref<128x1024xbf16, #tpu.memory_space<vmem>>, vector<128x1024xbf16>
    %cst = arith.constant dense<0.000000e+00> : vector<48x1024xf32>
    %6 = tpu.matmul %4, %5, %cst {dimension_numbers = #tpu.dot_dimension_numbers<[1], [0], [0], [1], [0, 0, 1, 1], [], []>} : vector<48x128xbf16>, vector<128x1024xbf16>, vector<48x1024xf32> -> vector<48x1024xf32>
    %c0_7 = arith.constant 0 : index
    %c0_8 = arith.constant 0 : index
    %7 = vector.load %arg7[%c0_7, %c0_8] : memref<1x1024xf32, #tpu.memory_space<vmem>>, vector<1x1024xf32>
    %8 = vector.broadcast %7 : vector<1x1024xf32> to vector<48x1024xf32>
    %9 = arith.addf %6, %8 : vector<48x1024xf32>
    %cst_9 = arith.constant 0.000000e+00 : f32
    %10 = vector.broadcast %cst_9 : f32 to vector<48x1024xf32>
    %11 = arith.maximumf %9, %10 : vector<48x1024xf32>
    %12 = vector.extract_strided_slice %11 {offsets = [0, 0], sizes = [16, 512], strides = [1, 1]} : vector<48x1024xf32> to vector<16x512xf32>
    %13 = vector.shape_cast %12 : vector<16x512xf32> to vector<2x8x512xf32>
    %14 = vector.extract_strided_slice %11 {offsets = [16, 512], sizes = [32, 512], strides = [1, 1]} : vector<48x1024xf32> to vector<32x512xf32>
    %15 = vector.shape_cast %14 : vector<32x512xf32> to vector<2x16x512xf32>
    %c0_10 = arith.constant 0 : index
    %c0_11 = arith.constant 0 : index
    %16 = vector.load %arg8[%c0_10, %c0_11] : memref<2x512xf32, #tpu.memory_space<vmem>>, vector<1x512xf32>
    %c1 = arith.constant 1 : index
    %c0_12 = arith.constant 0 : index
    %17 = vector.load %arg8[%c1, %c0_12] : memref<2x512xf32, #tpu.memory_space<vmem>>, vector<1x512xf32>
    %c0_13 = arith.constant 0 : index
    %18 = memref.load %arg9[%c0_13] : memref<2xf32, #tpu.memory_space<smem>>
    %c1_14 = arith.constant 1 : index
    %19 = memref.load %arg9[%c1_14] : memref<2xf32, #tpu.memory_space<smem>>
    %20 = vector.shape_cast %16 : vector<1x512xf32> to vector<1x1x512xf32>
    %21 = vector.broadcast %20 : vector<1x1x512xf32> to vector<2x8x512xf32>
    %22 = arith.mulf %13, %21 : vector<2x8x512xf32>
    %cst_15 = arith.constant dense<0.000000e+00> : vector<2x8xf32>
    %23 = vector.multi_reduction <add>, %22, %cst_15 [2] : vector<2x8x512xf32> to vector<2x8xf32>
    %24 = vector.broadcast %18 : f32 to vector<2x8xf32>
    %25 = arith.addf %23, %24 : vector<2x8xf32>
    %26 = vector.shape_cast %17 : vector<1x512xf32> to vector<1x1x512xf32>
    %27 = vector.broadcast %26 : vector<1x1x512xf32> to vector<2x16x512xf32>
    %28 = arith.mulf %15, %27 : vector<2x16x512xf32>
    %cst_16 = arith.constant dense<0.000000e+00> : vector<2x16xf32>
    %29 = vector.multi_reduction <add>, %28, %cst_16 [2] : vector<2x16x512xf32> to vector<2x16xf32>
    %30 = vector.broadcast %19 : f32 to vector<2x16xf32>
    %31 = arith.addf %29, %30 : vector<2x16xf32>
    %c0_17 = arith.constant 0 : index
    %c0_18 = arith.constant 0 : index
    %32 = vector.load %arg3[%c0_17, %c0_18] : memref<2x8xi32, #tpu.memory_space<vmem>>, vector<2x8xi32>
    %c0_19 = arith.constant 0 : index
    %c0_20 = arith.constant 0 : index
    %33 = vector.load %arg4[%c0_19, %c0_20] : memref<2x16xi32, #tpu.memory_space<vmem>>, vector<2x16xi32>
    %c0_21 = arith.constant 0 : index
    %c0_22 = arith.constant 0 : index
    %34 = vector.load %arg5[%c0_21, %c0_22] : memref<2x16xi32, #tpu.memory_space<vmem>>, vector<2x16xi32>
    %c0_i32 = arith.constant 0 : i32
    %35 = vector.broadcast %c0_i32 : i32 to vector<2x8xi32>
    %36 = arith.cmpi eq, %32, %35 : vector<2x8xi32>
    %cst_23 = arith.constant -1.000000e+09 : f32
    %37 = vector.broadcast %cst_23 : f32 to vector<2x8xf32>
    %38 = arith.select %36, %37, %25 : vector<2x8xi1>, vector<2x8xf32>
    %cst_24 = arith.constant dense<0xFF800000> : vector<2xf32>
    %39 = vector.multi_reduction <maximumf>, %38, %cst_24 [1] : vector<2x8xf32> to vector<2xf32>
    %40 = vector.shape_cast %39 : vector<2xf32> to vector<2x1xf32>
    %41 = vector.broadcast %40 : vector<2x1xf32> to vector<2x8xf32>
    %42 = arith.subf %38, %41 : vector<2x8xf32>
    %43 = math.exp %42 : vector<2x8xf32>
    %cst_25 = arith.constant dense<0.000000e+00> : vector<2xf32>
    %44 = vector.multi_reduction <add>, %43, %cst_25 [1] : vector<2x8xf32> to vector<2xf32>
    %45 = vector.shape_cast %44 : vector<2xf32> to vector<2x1xf32>
    %46 = vector.broadcast %45 : vector<2x1xf32> to vector<2x8xf32>
    %47 = arith.divf %43, %46 : vector<2x8xf32>
    %cst_26 = arith.constant 0.000000e+00 : f32
    %48 = vector.broadcast %cst_26 : f32 to vector<2x16xf32>
    %49 = arith.subf %48, %31 : vector<2x16xf32>
    %50 = math.exp %49 : vector<2x16xf32>
    %cst_27 = arith.constant 1.000000e+00 : f32
    %51 = vector.broadcast %cst_27 : f32 to vector<2x16xf32>
    %52 = arith.addf %51, %50 : vector<2x16xf32>
    %cst_28 = arith.constant 1.000000e+00 : f32
    %53 = vector.broadcast %cst_28 : f32 to vector<2x16xf32>
    %54 = arith.divf %53, %52 : vector<2x16xf32>
    %cst_29 = arith.constant 1.000000e-07 : f32
    %cst_30 = arith.constant 0.99999988 : f32
    %55 = vector.broadcast %cst_29 : f32 to vector<2x16xf32>
    %56 = arith.maximumf %55, %54 : vector<2x16xf32>
    %57 = vector.broadcast %cst_30 : f32 to vector<2x16xf32>
    %58 = arith.minimumf %57, %56 : vector<2x16xf32>
    %59 = tpu.iota {dimensions = array<i32: 2>} : vector<2x16x8xi32>
    %60 = vector.shape_cast %34 : vector<2x16xi32> to vector<2x16x1xi32>
    %61 = vector.broadcast %60 : vector<2x16x1xi32> to vector<2x16x8xi32>
    %62 = arith.cmpi eq, %59, %61 : vector<2x16x8xi32>
    %63 = vector.shape_cast %47 : vector<2x8xf32> to vector<2x1x8xf32>
    %cst_31 = arith.constant 0.000000e+00 : f32
    %64 = vector.shape_cast %63 : vector<2x1x8xf32> to vector<2x1x8xf32>
    %65 = vector.broadcast %64 : vector<2x1x8xf32> to vector<2x16x8xf32>
    %66 = vector.broadcast %cst_31 : f32 to vector<2x16x8xf32>
    %67 = arith.select %62, %65, %66 : vector<2x16x8xi1>, vector<2x16x8xf32>
    %cst_32 = arith.constant dense<0.000000e+00> : vector<2x16xf32>
    %68 = vector.multi_reduction <add>, %67, %cst_32 [2] : vector<2x16x8xf32> to vector<2x16xf32>
    %69 = arith.mulf %58, %68 : vector<2x16xf32>
    %cst_33 = arith.constant 1.000000e+00 : f32
    %70 = vector.broadcast %cst_33 : f32 to vector<2x16xf32>
    %71 = arith.subf %70, %69 : vector<2x16xf32>
    %72 = arith.divf %69, %71 : vector<2x16xf32>
    %73 = math.log %72 : vector<2x16xf32>
    %c0_i32_34 = arith.constant 0 : i32
    %74 = vector.broadcast %c0_i32_34 : i32 to vector<2x16xi32>
    %75 = arith.cmpi eq, %33, %74 : vector<2x16xi32>
    %cst_35 = arith.constant -1.000000e+09 : f32
    %76 = vector.broadcast %cst_35 : f32 to vector<2x16xf32>
    %77 = arith.select %75, %76, %73 : vector<2x16xi1>, vector<2x16xf32>
    %c0_36 = arith.constant 0 : index
    %c0_37 = arith.constant 0 : index
    %78 = vector.load %arg10[%c0_36, %c0_37] : memref<2x8xf32, #tpu.memory_space<vmem>>, vector<2x8xf32>
    tpu.vector_store %arg10[%c0_36, %c0_37], %38 {strides = array<i32>} : memref<2x8xf32, #tpu.memory_space<vmem>>, vector<2x8xf32>,
    %c0_38 = arith.constant 0 : index
    %c0_39 = arith.constant 0 : index
    %79 = vector.load %arg11[%c0_38, %c0_39] : memref<2x16xf32, #tpu.memory_space<vmem>>, vector<2x16xf32>
    tpu.vector_store %arg11[%c0_38, %c0_39], %77 {strides = array<i32>} : memref<2x16xf32, #tpu.memory_space<vmem>>, vector<2x16xf32>,
    return
  }
  func.func @transform_0(%arg0: i32) -> (i32, i32, i32) {
    %c0_i32 = arith.constant 0 : i32
    %c0_i32_0 = arith.constant 0 : i32
    %c0_i32_1 = arith.constant 0 : i32
    return %arg0, %c0_i32, %c0_i32_0 : i32, i32, i32
  }
  func.func @transform_1(%arg0: i32) -> (i32, i32, i32) {
    %c0_i32 = arith.constant 0 : i32
    %c0_i32_0 = arith.constant 0 : i32
    %c0_i32_1 = arith.constant 0 : i32
    return %arg0, %c0_i32, %c0_i32_0 : i32, i32, i32
  }
  func.func @transform_2(%arg0: i32) -> (i32, i32) {
    %c0_i32 = arith.constant 0 : i32
    %c0_i32_0 = arith.constant 0 : i32
    return %arg0, %c0_i32 : i32, i32
  }
  func.func @transform_3(%arg0: i32) -> (i32, i32) {
    %c0_i32 = arith.constant 0 : i32
    %c0_i32_0 = arith.constant 0 : i32
    return %arg0, %c0_i32 : i32, i32
  }
  func.func @transform_4(%arg0: i32) -> (i32, i32) {
    %c0_i32 = arith.constant 0 : i32
    %c0_i32_0 = arith.constant 0 : i32
    return %arg0, %c0_i32 : i32, i32
  }
  func.func @transform_5(%arg0: i32) -> (i32, i32) {
    %c0_i32 = arith.constant 0 : i32
    %c0_i32_0 = arith.constant 0 : i32
    %c0_i32_1 = arith.constant 0 : i32
    return %c0_i32, %c0_i32_0 : i32, i32
  }
  func.func @transform_6(%arg0: i32) -> (i32, i32) {
    %c0_i32 = arith.constant 0 : i32
    %c0_i32_0 = arith.constant 0 : i32
    %c0_i32_1 = arith.constant 0 : i32
    return %c0_i32, %c0_i32_0 : i32, i32
  }
  func.func @transform_7(%arg0: i32) -> (i32, i32) {
    %c0_i32 = arith.constant 0 : i32
    %c0_i32_0 = arith.constant 0 : i32
    %c0_i32_1 = arith.constant 0 : i32
    return %c0_i32, %c0_i32_0 : i32, i32
  }
  func.func @transform_8(%arg0: i32) -> i32 {
    %c0_i32 = arith.constant 0 : i32
    %c0_i32_0 = arith.constant 0 : i32
    return %c0_i32 : i32
  }
  func.func @transform_9(%arg0: i32) -> (i32, i32) {
    %c0_i32 = arith.constant 0 : i32
    %c0_i32_0 = arith.constant 0 : i32
    return %arg0, %c0_i32 : i32, i32
  }
  func.func @transform_10(%arg0: i32) -> (i32, i32) {
    %c0_i32 = arith.constant 0 : i32
    %c0_i32_0 = arith.constant 0 : i32
    return %arg0, %c0_i32 : i32, i32
  }
}

</mosaic_0001>

<bundles_post_ra>
// kernel: tpu_custom_call.1
= control target key start
LH: loop header
LB: loop body
LE: loop exit
PB: predicated region body
PF: predicated region fallthrough
CT: control target
= control target key end

     0   :  { %16 = vsyncpa [#allocation3], 0  ;;  %s1721_s0 = inlined_call_operand.hbm [shape: bf16[2,8,128], index: 0, kind: input, shape index: {}]   ;;  %s1722_s1 = inlined_call_operand.hbm [shape: bf16[2,16,128], index: 1, kind: input, shape index: {}]   ;;  %s1723_s2 = inlined_call_operand.vmem [shape: s32[2,8], index: 2, kind: input, shape index: {}]   ;;  %s1724_s3 = inlined_call_operand.hbm [shape: s32[2,16], index: 3, kind: input, shape index: {}]   ;;  %s1725_s4 = inlined_call_operand.hbm [shape: s32[2,16], index: 4, kind: input, shape index: {}]   ;;  %s1726_s5 = inlined_call_operand.hbm [shape: bf16[128,1024], index: 5, kind: input, shape index: {}]   ;;  %s1727_s6 = inlined_call_operand.vmem [shape: f32[1,1024], index: 6, kind: input, shape index: {}]   ;;  %s1728_s7 = inlined_call_operand.hbm [shape: f32[2,512], index: 7, kind: input, shape index: {}]   ;;  %s1729_s8 = inlined_call_operand.vmem [shape: f32[2], index: 8, kind: input, shape index: {}]   ;;  %s1730_s9 = inlined_call_operand.hbm [shape: f32[2,8], index: 9, kind: output, shape index: {0}]   ;;  %s1731_s10 = inlined_call_operand.hbm [shape: f32[2,16], index: 10, kind: output, shape index: {1}]  }
   0x1   :  { %17 = vsyncpa [#allocation7], 0 }
   0x2   :  { %18 = vsyncpa [#allocation10], 0 }
   0x3   :  { %19 = vsyncpa [#allocation13], 0 }
   0x4   :  { %20 = vsyncpa [#allocation5], 0 }
   0x5   :  { %21 = vsyncpa [#allocation4], 0 }
   0x6   :  { %22 = vsyncpa [#allocation17], 0  ;;  %s1473_s13 = smov [#allocation6]   ;;  %s1474_s15 = smov [#allocation9]  }
   0x7   :  { %s40_s14 = sshll.u32 %s1473_s13, 4  ;;  %s65_s16 = sshll.u32 %s1474_s15, 4  ;;  %s41_s14 = int_to_ptr.vmem [resolvable:$true] %s40_s14  ;;  %s66_s16 = int_to_ptr.vmem [resolvable:$true] %s65_s16 }
   0x8   :  { %s1295_s17 = scalar_lea.vmem %s41_s14, 256  ;;  %p1300_p1 = scmp.lt.s32.totalorder %s41_s14, %s41_s14 }
   0x9   :  { %p1296_p0 = scmp.ne.s32.totalorder %s41_s14, %s1295_s17  ;;  %p1301_p2 = scmp.lt.s32.totalorder %s1295_s17, %s1295_s17 }
   0xb   :  { %p1302_p3 = por %p1301_p2, %p1300_p1 }
   0xd   :  { %p1303_p4 = pnand %p1302_p3, %p1296_p0 }
   0xf   :  { %1306 = shalt.err (!%p1303_p4)
}
  0x10   :  { %s1475_s18 = smov 64   ;;  %s1476_s19 = smov 4  }
  0x11   :  { %46 = dma.hbm_to_vmem [thread:$0]  %s1722_s1, 256, %s41_s14, [#allocation7], %s1475_s18, %s1475_s18, %s1476_s19  }
  0x12   :  { %s1315_s22 = scalar_lea.vmem %s66_s16, 32  ;;  %p1320_p6 = scmp.lt.s32.totalorder %s66_s16, %s66_s16 }
  0x13   :  { %p1316_p5 = scmp.ne.s32.totalorder %s66_s16, %s1315_s22  ;;  %p1321_p7 = scmp.lt.s32.totalorder %s1315_s22, %s1315_s22 }
  0x15   :  { %p1322_p8 = por %p1321_p7, %p1320_p6 }
  0x17   :  { %p1323_p9 = pnand %p1322_p8, %p1316_p5 }
  0x19   :  { %1326 = shalt.err (!%p1323_p9)
}
  0x1a   :  { %68 = dma.hbm_to_vmem [thread:$0]  %s1725_s4, 32, %s66_s16, [#allocation10]  }
  0x1b   :  { %s1477_s25 = smov [#allocation2]   ;;  %s1478_s27 = smov [#allocation8]  }
  0x1c   :  { %s28_s26 = sshll.u32 %s1477_s25, 4  ;;  %s55_s28 = sshll.u32 %s1478_s27, 4  ;;  %s29_s26 = int_to_ptr.vmem [resolvable:$true] %s28_s26  ;;  %s56_s28 = int_to_ptr.vmem [resolvable:$true] %s55_s28 }
  0x1d   :  { %s1335_s29 = scalar_lea.vmem %s29_s26, 128  ;;  %p1340_p11 = scmp.lt.s32.totalorder %s29_s26, %s29_s26 }
  0x1e   :  { %p1336_p10 = scmp.ne.s32.totalorder %s29_s26, %s1335_s29  ;;  %p1341_p12 = scmp.lt.s32.totalorder %s1335_s29, %s1335_s29 }
  0x20   :  { %p1342_p13 = por %p1341_p12, %p1340_p11 }
  0x22   :  { %p1343_p0 = pnand %p1342_p13, %p1336_p10 }
  0x24   :  { %1346 = shalt.err (!%p1343_p0)
}
  0x25   :  { %34 = dma.hbm_to_vmem [thread:$0]  %s1721_s0, 128, %s29_s26, [#allocation3], %s1475_s18, %s1475_s18, %s1476_s19  }
  0x26   :  { %s1355_s11 = scalar_lea.vmem %s56_s28, 32  ;;  %p1360_p2 = scmp.lt.s32.totalorder %s56_s28, %s56_s28 }
  0x27   :  { %p1356_p1 = scmp.ne.s32.totalorder %s56_s28, %s1355_s11  ;;  %p1361_p3 = scmp.lt.s32.totalorder %s1355_s11, %s1355_s11 }
  0x29   :  { %p1362_p4 = por %p1361_p3, %p1360_p2 }
  0x2b   :  { %p1363_p5 = pnand %p1362_p4, %p1356_p1 }
  0x2d   :  { %1366 = shalt.err (!%p1363_p5)
}
  0x2e   :  { %58 = dma.hbm_to_vmem [thread:$0]  %s1724_s3, 32, %s56_s28, [#allocation7]  }
  0x2f   :  { %s1479_s13 = smov [#allocation11]  }
  0x30   :  { %s74_s14 = sshll.u32 %s1479_s13, 4  ;;  %s75_s14 = int_to_ptr.vmem [resolvable:$true] %s74_s14 }
  0x31   :  { %s1375_s15 = scalar_lea.vmem %s75_s14, 8192  ;;  %p1380_p7 = scmp.lt.s32.totalorder %s75_s14, %s75_s14 }
  0x32   :  { %p1376_p6 = scmp.ne.s32.totalorder %s75_s14, %s1375_s15  ;;  %p1381_p8 = scmp.lt.s32.totalorder %s1375_s15, %s1375_s15 }
  0x34   :  { %p1382_p9 = por %p1381_p8, %p1380_p7 }
  0x36   :  { %p1383_p10 = pnand %p1382_p9, %p1376_p6 }
  0x38   :  { %1386 = shalt.err (!%p1383_p10)
}
  0x39   :  { %s1480_s0 = smov 512   ;;  %s1481_s16 = smov 32  }
  0x3a   :  { %80 = dma.hbm_to_vmem [thread:$0]  %s1726_s5, 8192, %s75_s14, [#allocation10], %s1480_s0, %s1480_s0, %s1481_s16  }
  0x3b   :  { %s1482_s19 = smov [#allocation12]   ;;  %s99_s22 = sshll.u32 %s1729_s8, 4  ;;  %s100_s22 = int_to_ptr.vmem [resolvable:$true] %s99_s22 }
  0x3c   :  { %s89_s20 = sshll.u32 %s1482_s19, 4  ;;  %s90_s20 = int_to_ptr.vmem [resolvable:$true] %s89_s20 }
  0x3d   :  { %s1395_s23 = scalar_lea.vmem %s90_s20, 128  ;;  %p1400_p12 = scmp.lt.s32.totalorder %s90_s20, %s90_s20 }
  0x3e   :  { %p1396_p11 = scmp.ne.s32.totalorder %s90_s20, %s1395_s23  ;;  %p1401_p13 = scmp.lt.s32.totalorder %s1395_s23, %s1395_s23 }
  0x40   :  { %p1402_p0 = por %p1401_p13, %p1400_p12 }
  0x42   :  { %p1403_p1 = pnand %p1402_p0, %p1396_p11 }
  0x44   :  { %1406 = shalt.err (!%p1403_p1)
}
  0x45   :  { %92 = dma.hbm_to_vmem [thread:$0]  %s1728_s7, 128, %s90_s20, [#allocation13]  }
  0x46   :  { %s1407_s5 = scalar_lea.vmem %s100_s22, 16  ;;  %p1412_p3 = scmp.lt.s32.totalorder %s100_s22, %s100_s22 }
  0x47   :  { %p1408_p2 = scmp.ne.s32.totalorder %s100_s22, %s1407_s5  ;;  %p1413_p4 = scmp.lt.s32.totalorder %s1407_s5, %s1407_s5 }
  0x49   :  { %p1414_p5 = por %p1413_p4, %p1412_p3 }
  0x4b   :  { %p1415_p6 = pnand %p1414_p5, %p1408_p2 }
  0x4d   :  { %1418 = shalt.err (!%p1415_p6)
}
  0x4e   :  { %s1483_s8 = smov [#allocation14]  }
  0x4f   :  { %102 = dma.vmem_to_smem %s100_s22, 16, %s1483_s8, [#allocation5]  }
  0x50   :  { %1459 = dma.done.wait [#allocation3], 128  }
  0x51   :  { %1460 = vsyncadd [#allocation3], 4294967168 }
  0x52   :  { %1461 = dma.done.wait [#allocation7], 288  }
  0x53   :  { %1462 = vsyncadd [#allocation7], 4294967008 }
  0x54   :  { %1463 = dma.done.wait [#allocation10], 8224  }
  0x55   :  { %1464 = vsyncadd [#allocation10], 4294959072 }
  0x56   :  { %1465 = dma.done.wait [#allocation13], 128  }
  0x57   :  { %1466 = vsyncadd [#allocation13], 4294967168 }
  0x58   :  { %1467 = dma.done.wait [#allocation5], 16  }
  0x59   :  { %1468 = vsyncadd [#allocation5], 4294967280 }
  0x5a   :  { %124 = sfence }
  0x5b   :  { %v206_v0 = vld [vmem:[#allocation11 + $0x1c0] sm:$0xff]  ;;  %v207_v2 = vld [vmem:[#allocation11 + $0x1c8] sm:$0xff]  ;;  %v1484_v8 = vmov 0   ;;  %vm953_vm0 = vcmask 1041409   ;;  %vm957_vm2 = vcmask 58368   ;;  %vm1064_vm4 = vcmask 64512  }
  0x5c   :  { %v210_v1 = vld [vmem:[#allocation11 + $0x1e0] sm:$0xff]  ;;  %v211_v4 = vld [vmem:[#allocation11 + $0x1e8] sm:$0xff]  ;;  %608 = vmatprep.mubr.bf16.mxu0 %v1484_v8  ;;  %663 = vmatprep.mubr.bf16.mxu1 %v1484_v8 }
  0x5d   :  { %v1225_v3 = vcombine.high %v206_v0, %v210_v1  ;;  %v1224_v5 = vcombine.low %v206_v0, %v210_v1  ;;  %v198_v6 = vld [vmem:[#allocation11 + $0x180] sm:$0xff]  ;;  %v1227_v9 = vcombine.high %v207_v2, %v211_v4  ;;  %v1226_v10 = vcombine.low %v207_v2, %v211_v4  ;;  %v199_v12 = vld [vmem:[#allocation11 + $0x188] sm:$0xff] }
  0x5e   :  { %v202_v7 = vld [vmem:[#allocation11 + $0x1a0] sm:$0xff]  ;;  %v203_v13 = vld [vmem:[#allocation11 + $0x1a8] sm:$0xff]  ;;  %v216_v2 = vlaneseq }
  0x5f   :  { %v1217_v11 = vcombine.high %v198_v6, %v202_v7  ;;  %v190_v14 = vld [vmem:[#allocation11 + $0x140] sm:$0xff]  ;;  %576 = vmatprep.subr.bf16.mxu0 %v1225_v3  ;;  %v1219_v15 = vcombine.high %v199_v12, %v203_v13  ;;  %v191_v17 = vld [vmem:[#allocation11 + $0x148] sm:$0xff]  ;;  %631 = vmatprep.subr.bf16.mxu1 %v1227_v9  ;;  %v1216_v19 = vcombine.low %v198_v6, %v202_v7 }
  0x60   :  { %v194_v16 = vld [vmem:[#allocation11 + $0x160] sm:$0xff]  ;;  %v195_v18 = vld [vmem:[#allocation11 + $0x168] sm:$0xff]  ;;  %577 = vmatpush1.bf16.msra.mxu0 %v1224_v5  ;;  %632 = vmatpush1.bf16.msra.mxu1 %v1226_v10  ;;  %v1218_v20 = vcombine.low %v199_v12, %v203_v13  ;;  %v1573_v3 = vshrl.u32 %v216_v2, 7 }
  0x61   :  { %578 = vmatprep.subr.bf16.mxu0 %v1217_v11  ;;  %v1209_v21 = vcombine.high %v190_v14, %v194_v16  ;;  %633 = vmatprep.subr.bf16.mxu1 %v1219_v15  ;;  %v1211_v22 = vcombine.high %v191_v17, %v195_v18  ;;  %v182_v23 = vld [vmem:[#allocation11 + $0x100] sm:$0xff]  ;;  %v183_v25 = vld [vmem:[#allocation11 + $0x108] sm:$0xff]  ;;  %v1208_v27 = vcombine.low %v190_v14, %v194_v16 }
  0x62   :  { %v186_v24 = vld [vmem:[#allocation11 + $0x120] sm:$0xff]  ;;  %v187_v26 = vld [vmem:[#allocation11 + $0x128] sm:$0xff]  ;;  %v1210_v28 = vcombine.low %v191_v17, %v195_v18  ;;  %v1576_v4 = vsub.s32 0, %v1573_v3  ;;  %v1584_v6 = vsub.s32 2, %v1573_v3  ;;  %v1587_v7 = vsub.s32 1, %v1573_v3 }
  0x63   :  { %v1201_v29 = vcombine.high %v182_v23, %v186_v24  ;;  %v1203_v30 = vcombine.high %v183_v25, %v187_v26  ;;  %v174_v31 = vld [vmem:[#allocation11 + $0xc0] sm:$0xff]  ;;  %v175_v33 = vld [vmem:[#allocation11 + $0xc8] sm:$0xff]  ;;  %v1200_v35 = vcombine.low %v182_v23, %v186_v24  ;;  %v1202_v36 = vcombine.low %v183_v25, %v187_v26 }
  0x64   :  { %579 = vmatpush1.bf16.msra.mxu0 %v1216_v19  ;;  %634 = vmatpush1.bf16.msra.mxu1 %v1218_v20  ;;  %v178_v32 = vld [vmem:[#allocation11 + $0xe0] sm:$0xff]  ;;  %v179_v34 = vld [vmem:[#allocation11 + $0xe8] sm:$0xff]  ;;  %v1590_v9 = vsub.s32 3, %v1573_v3 }
  0x65   :  { %580 = vmatprep.subr.bf16.mxu0 %v1209_v21  ;;  %635 = vmatprep.subr.bf16.mxu1 %v1211_v22  ;;  %v1193_v37 = vcombine.high %v174_v31, %v178_v32  ;;  %v1195_v38 = vcombine.high %v175_v33, %v179_v34  ;;  %v166_v39 = vld [vmem:[#allocation11 + $0x80] sm:$0xff]  ;;  %v167_v41 = vld [vmem:[#allocation11 + $0x88] sm:$0xff]  ;;  %v1192_v43 = vcombine.low %v174_v31, %v178_v32 }
  0x66   :  { %v170_v40 = vld [vmem:[#allocation11 + $0xa0] sm:$0xff]  ;;  %v171_v42 = vld [vmem:[#allocation11 + $0xa8] sm:$0xff]  ;;  %v1194_v44 = vcombine.low %v175_v33, %v179_v34 }
  0x67   :  { %v1185_v45 = vcombine.high %v166_v39, %v170_v40  ;;  %v1187_v46 = vcombine.high %v167_v41, %v171_v42  ;;  %v158_v47 = vld [vmem:[#allocation11 + $0x40] sm:$0xff]  ;;  %v159_v49 = vld [vmem:[#allocation11 + $0x48] sm:$0xff]  ;;  %v1184_v51 = vcombine.low %v166_v39, %v170_v40  ;;  %v1186_v52 = vcombine.low %v167_v41, %v171_v42 }
  0x68   :  { %581 = vmatpush1.bf16.msra.mxu0 %v1208_v27  ;;  %636 = vmatpush1.bf16.msra.mxu1 %v1210_v28  ;;  %v162_v48 = vld [vmem:[#allocation11 + $0x60] sm:$0xff]  ;;  %v163_v50 = vld [vmem:[#allocation11 + $0x68] sm:$0xff] }
  0x69   :  { %582 = vmatprep.subr.bf16.mxu0 %v1201_v29  ;;  %637 = vmatprep.subr.bf16.mxu1 %v1203_v30  ;;  %v1177_v53 = vcombine.high %v158_v47, %v162_v48  ;;  %v1179_v54 = vcombine.high %v159_v49, %v163_v50  ;;  %v150_v55 = vld [vmem:[#allocation11] sm:$0xff]  ;;  %v151_v57 = vld [vmem:[#allocation11 + $0x8] sm:$0xff]  ;;  %v1176_v59 = vcombine.low %v158_v47, %v162_v48 }
  0x6a   :  { %v154_v56 = vld [vmem:[#allocation11 + $0x20] sm:$0xff]  ;;  %v155_v58 = vld [vmem:[#allocation11 + $0x28] sm:$0xff]  ;;  %v1178_v60 = vcombine.low %v159_v49, %v163_v50 }
  0x6b   :  { %v1169_v61 = vcombine.high %v150_v55, %v154_v56  ;;  %v1171_v62 = vcombine.high %v151_v57, %v155_v58  ;;  %v1168_v63 = vcombine.low %v150_v55, %v154_v56  ;;  %v1170_v0 = vcombine.low %v151_v57, %v155_v58  ;;  %v1566_v1 = vld [vmem:[#allocation2] sm:$0xff]   ;;  %v208_v57 = vld [vmem:[#allocation11 + $0x1d0] sm:$0xff] }
  0x6c   :  { %583 = vmatpush1.bf16.msra.mxu0 %v1200_v35  ;;  %638 = vmatpush1.bf16.msra.mxu1 %v1202_v36  ;;  %v1581_v5 = vld [vmem:[%s1727_s6] sm:$0xff]  ;;  %v212_v58 = vld [vmem:[#allocation11 + $0x1f0] sm:$0xff]  ;;  %s831_s6 = sld [smem:[#allocation14]] }
  0x6d   :  { %584 = vmatprep.subr.bf16.mxu0 %v1193_v37  ;;  %639 = vmatprep.subr.bf16.mxu1 %v1195_v38  ;;  %v219_v10 = vrot.slane %v1581_v5, %v1576_v4  ;;  %v227_v11 = vrot.slane %v1581_v5, %v1584_v6  ;;  %v828_v12 = vld [vmem:[#allocation12] ss:$2 sm:$0xf]  ;;  %v223_v13 = vrot.slane %v1581_v5, %v1587_v7 }
  0x6e   :  { %v231_v15 = vrot.slane %v1581_v5, %v1590_v9  ;;  %v837_v18 = vrot.slane %v828_v12, %v1576_v4  ;;  %v845_v22 = vrot.slane %v828_v12, %v1584_v6  ;;  %v841_v24 = vrot.slane %v828_v12, %v1587_v7 }
  0x6f   :  { %v849_v36 = vrot.slane %v828_v12, %v1590_v9 }
  0x70   :  { %585 = vmatpush1.bf16.msra.mxu0 %v1192_v43  ;;  %640 = vmatpush1.bf16.msra.mxu1 %v1194_v44 }
  0x71   :  { %586 = vmatprep.subr.bf16.mxu0 %v1185_v45  ;;  %641 = vmatprep.subr.bf16.mxu1 %v1187_v46 }
  0x74   :  { %587 = vmatpush1.bf16.msra.mxu0 %v1184_v51  ;;  %642 = vmatpush1.bf16.msra.mxu1 %v1186_v52 }
  0x75   :  { %588 = vmatprep.subr.bf16.mxu0 %v1177_v53  ;;  %643 = vmatprep.subr.bf16.mxu1 %v1179_v54 }
  0x78   :  { %589 = vmatpush1.bf16.msra.mxu0 %v1176_v59  ;;  %644 = vmatpush1.bf16.msra.mxu1 %v1178_v60  ;;  %v200_v59 = vld [vmem:[#allocation11 + $0x190] sm:$0xff]  ;;  %v1228_v60 = vcombine.low %v208_v57, %v212_v58 }
  0x79   :  { %590 = vmatprep.subr.bf16.mxu0 %v1169_v61  ;;  %645 = vmatprep.subr.bf16.mxu1 %v1171_v62  ;;  %v1229_v61 = vcombine.high %v208_v57, %v212_v58  ;;  %v204_v62 = vld [vmem:[#allocation11 + $0x1b0] sm:$0xff] }
  0x7c   :  { %591 = vmatpush1.bf16.msra.mxu0 %v1168_v63  ;;  %646 = vmatpush1.bf16.msra.mxu1 %v1170_v0  ;;  %v209_v63 = vld [vmem:[#allocation11 + $0x1d8] sm:$0xff] }
  0x7d   :  { %v213_v0 = vld [vmem:[#allocation11 + $0x1f8] sm:$0xff]  ;;  %686 = vmatprep.subr.bf16.mxu0 %v1229_v61 }
  0x7e   :  { %v1231_v12 = vcombine.high %v209_v63, %v213_v0 }
  0x7f   :  { %609 = vmatmul.mubr.bf16.vlgmr.msra.gmra.mxu0 %v1566_v1  ;;  %664 = vmatmul.mubr.bf16.vlgmr.msra.gmra.mxu1 %v1566_v1 }
  0x80   :  { %618 = vmatprep.mubr.bf16.mxu0 %v1484_v8  ;;  %673 = vmatprep.mubr.bf16.mxu1 %v1484_v8 }
  0x81   :  { %687 = vmatpush1.bf16.msra.mxu0 %v1228_v60  ;;  %745 = vmatprep.subr.bf16.mxu1 %v1231_v12  ;;  %v156_v60 = vld [vmem:[#allocation11 + $0x30] sm:$0xff] }
 0x13f   :  { %v610_v14 = vpop.f32.mrf.mxu0  ;;  %v665_v17 = vpop.f32.mrf.mxu1 }
 0x140   :  { %v611_v16 = vadd.f32 %v610_v14, %v219_v10  ;;  %v666_v19 = vadd.f32 %v665_v17, %v227_v11  ;;  %v196_v14 = vld [vmem:[#allocation11 + $0x170] sm:$0xff]  ;;  %v1220_v17 = vcombine.low %v200_v59, %v204_v62 }
 0x141   :  { %v612_v20 = vpop.f32.mrf.mxu0  ;;  %v667_v25 = vpop.f32.mrf.mxu1 }
 0x142   :  { %v804_v21 = vmax.f32 %v611_v16, 0.0  ;;  %v613_v23 = vadd.f32 %v612_v20, %v223_v13  ;;  %v806_v26 = vmax.f32 %v666_v19, 0.0  ;;  %v668_v27 = vadd.f32 %v667_v25, %v231_v15  ;;  %v205_v16 = vld [vmem:[#allocation11 + $0x1b8] sm:$0xff]  ;;  %v188_v25 = vld [vmem:[#allocation11 + $0x130] sm:$0xff] }
 0x143   :  { %v614_v28 = vpop.f32.mrf.mxu0  ;;  %v669_v31 = vpop.f32.mrf.mxu1  ;;  %v193_v19 = vld [vmem:[#allocation11 + $0x158] sm:$0xff] }
 0x144   :  { %v805_v29 = vmax.f32 %v613_v23, 0.0  ;;  %v615_v30 = vadd.f32 %v614_v28, %v219_v10  ;;  %v854_v32 = vmul.f32 %v837_v18, %v804_v21  ;;  %v807_v33 = vmax.f32 %v668_v27, 0.0  ;;  %v197_v20 = vld [vmem:[#allocation11 + $0x178] sm:$0xff]  ;;  %v1604_v21 = vld [vmem:[#allocation6] sm:$0xff]  }
 0x145   :  { %v670_v34 = vadd.f32 %v669_v31, %v227_v11  ;;  %v616_v35 = vpop.f32.mrf.mxu0  ;;  %v856_v37 = vmul.f32 %v845_v22, %v806_v26  ;;  %v671_v41 = vpop.f32.mrf.mxu1  ;;  %v1221_v10 = vcombine.high %v200_v59, %v204_v62  ;;  %v1230_v11 = vcombine.low %v209_v63, %v213_v0  ;;  %619 = vmatmul.mubr.bf16.gmra.mxu0 %v1604_v21  ;;  %v185_v27 = vld [vmem:[#allocation11 + $0x118] sm:$0xff]  ;;  %v152_v59 = vld [vmem:[#allocation11 + $0x10] sm:$0xff] }
 0x146   :  { %v855_v38 = vmul.f32 %v841_v24, %v805_v29  ;;  %v808_v39 = vmax.f32 %v615_v30, 0.0  ;;  %v617_v40 = vadd.f32 %v616_v35, %v223_v13  ;;  %v672_v42 = vadd.f32 %v671_v41, %v231_v15  ;;  %v192_v13 = vld [vmem:[#allocation11 + $0x150] sm:$0xff]  ;;  %v201_v15 = vld [vmem:[#allocation11 + $0x198] sm:$0xff]  ;;  %674 = vmatmul.mubr.bf16.gmra.mxu1 %v1604_v21  ;;  %624 = vmatprep.mubr.bf16.mxu0 %v1484_v8 }
 0x147   :  { %v810_v43 = vmax.f32 %v670_v34, 0.0  ;;  %v857_v46 = vmul.f32 %v849_v36, %v807_v33  ;;  %688 = vmatprep.subr.bf16.mxu0 %v1221_v10  ;;  %746 = vmatpush1.bf16.msra.mxu1 %v1230_v11  ;;  %v1222_v23 = vcombine.low %v201_v15, %v205_v16  ;;  %v1215_v26 = vcombine.high %v193_v19, %v197_v20  ;;  %v189_v28 = vld [vmem:[#allocation11 + $0x138] sm:$0xff]  ;;  %v180_v33 = vld [vmem:[#allocation11 + $0xf0] sm:$0xff] }
 0x148   :  { %v809_v44 = vmax.f32 %v617_v40, 0.0  ;;  %v862_v45 = vadd.f32 %v855_v38, %v854_v32  ;;  %v858_v47 = vmul.f32 %v837_v18, %v808_v39  ;;  %v811_v49 = vmax.f32 %v672_v42, 0.0  ;;  %689 = vmatpush1.bf16.msra.mxu0 %v1220_v17  ;;  %v176_v32 = vld [vmem:[#allocation11 + $0xd0] sm:$0xff]  ;;  %679 = vmatprep.mubr.bf16.mxu1 %v1484_v8  ;;  %v1612_v41 = vld [vmem:[#allocation9] sm:$0x3] }
 0x149   :  { %v860_v51 = vmul.f32 %v845_v22, %v810_v43  ;;  %v1223_v18 = vcombine.high %v201_v15, %v205_v16  ;;  %v1213_v22 = vcombine.high %v192_v13, %v196_v14  ;;  %v1212_v29 = vcombine.low %v192_v13, %v196_v14  ;;  %v1609_v35 = vld [vmem:[#allocation6 + $0x8] sm:$0xff]  }
 0x14a   :  { %v859_v48 = vmul.f32 %v841_v24, %v809_v44  ;;  %v863_v50 = vadd.f32 %v862_v45, %v856_v37  ;;  %v861_v54 = vmul.f32 %v849_v36, %v811_v49  ;;  %v184_v24 = vld [vmem:[#allocation11 + $0x110] sm:$0xff]  ;;  %v1214_v31 = vcombine.low %v193_v19, %v197_v20  ;;  %v177_v36 = vld [vmem:[#allocation11 + $0xd8] sm:$0xff] }
 0x14b   :  { %747 = vmatprep.subr.bf16.mxu1 %v1223_v18  ;;  %690 = vmatprep.subr.bf16.mxu0 %v1213_v22  ;;  %v1205_v30 = vcombine.high %v184_v24, %v188_v25  ;;  %v1207_v34 = vcombine.high %v185_v27, %v189_v28  ;;  %v181_v37 = vld [vmem:[#allocation11 + $0xf8] sm:$0xff]  ;;  %v1204_v38 = vcombine.low %v184_v24, %v188_v25  ;;  %v168_v42 = vld [vmem:[#allocation11 + $0x90] sm:$0xff]  ;;  %v1634_v15 = vand.u32 127, %v216_v2 }
 0x14c   :  { %v867_v52 = vadd.f32 %v859_v48, %v858_v47  ;;  %v864_v53 = vadd.f32 %v863_v50, %v857_v46  ;;  %748 = vmatpush1.bf16.msra.mxu1 %v1222_v23  ;;  %691 = vmatpush1.bf16.msra.mxu0 %v1212_v29  ;;  %v1197_v39 = vcombine.high %v176_v32, %v180_v33  ;;  %v172_v43 = vld [vmem:[#allocation11 + $0xb0] sm:$0xff]  ;;  %v169_v45 = vld [vmem:[#allocation11 + $0x98] sm:$0xff] }
 0x14d   :  { %749 = vmatprep.subr.bf16.mxu1 %v1215_v26  ;;  %692 = vmatprep.subr.bf16.mxu0 %v1205_v30  ;;  %v1206_v40 = vcombine.low %v185_v27, %v189_v28  ;;  %v1199_v44 = vcombine.high %v177_v36, %v181_v37  ;;  %v173_v46 = vld [vmem:[#allocation11 + $0xb8] sm:$0xff]  ;;  %v1196_v47 = vcombine.low %v176_v32, %v180_v33 }
 0x14e   :  { %865 = vadd.xlane.f32.xlu0 %v864_v53  ;;  %v868_v55 = vadd.f32 %v867_v52, %v860_v51  ;;  %625 = vmatmul.mubr.bf16.gmra.mxu0 %v1609_v35  ;;  %v1620_v48 = vrot.slane %v1612_v41, %v1576_v4  ;;  %v1189_v49 = vcombine.high %v168_v42, %v172_v43  ;;  %v160_v51 = vld [vmem:[#allocation11 + $0x50] sm:$0xff]  ;;  %v153_v62 = vld [vmem:[#allocation11 + $0x18] sm:$0xff] }
 0x14f   :  { %680 = vmatmul.mubr.bf16.gmra.mxu1 %v1609_v35  ;;  %718 = vmatprep.mubr.bf16.mxu0 %v1484_v8  ;;  %v1198_v50 = vcombine.low %v177_v36, %v181_v37  ;;  %v164_v52 = vld [vmem:[#allocation11 + $0x70] sm:$0xff]  ;;  %v1191_v53 = vcombine.high %v169_v45, %v173_v46  ;;  %v1190_v58 = vcombine.low %v169_v45, %v173_v46  ;;  %v157_v63 = vld [vmem:[#allocation11 + $0x38] sm:$0xff]  ;;  %v242_v46 = vsub.s32 6, %v1573_v3 }
 0x150   :  { %v869_v56 = vadd.f32 %v868_v55, %v861_v54  ;;  %750 = vmatpush1.bf16.msra.mxu1 %v1214_v31  ;;  %693 = vmatpush1.bf16.msra.mxu0 %v1204_v38  ;;  %v161_v54 = vld [vmem:[#allocation11 + $0x58] sm:$0xff]  ;;  %v1181_v57 = vcombine.high %v160_v51, %v164_v52  ;;  %v1180_v0 = vcombine.low %v160_v51, %v164_v52 }
 0x151   :  { %751 = vmatprep.subr.bf16.mxu1 %v1207_v34  ;;  %777 = vmatprep.mubr.bf16.mxu1 %v1484_v8  ;;  %v165_v55 = vld [vmem:[#allocation11 + $0x78] sm:$0xff]  ;;  %v1173_v10 = vcombine.high %v152_v59, %v156_v60  ;;  %v1175_v12 = vcombine.high %v153_v62, %v157_v63  ;;  %v1172_v13 = vcombine.low %v152_v59, %v156_v60 }
 0x152   :  { %870 = vadd.xlane.f32.xlu0 %v869_v56  ;;  %694 = vmatprep.subr.bf16.mxu0 %v1197_v39  ;;  %v1188_v56 = vcombine.low %v168_v42, %v172_v43  ;;  %v1183_v61 = vcombine.high %v161_v54, %v165_v55  ;;  %v1182_v11 = vcombine.low %v161_v54, %v165_v55  ;;  %v830_v54 = vld [vmem:[#allocation12 + $0x1] ss:$2 sm:$0xf] }
 0x153   :  { %v1174_v14 = vcombine.low %v153_v62, %v157_v63  ;;  %v1638_v17 = vsub.s32 %v1634_v15, %v1573_v3  ;;  %v1655_v25 = vrot.slane %v1612_v41, %v1587_v7  ;;  %v243_v55 = vrot.slane %v1581_v5, %v242_v46 }
 0x154   :  { %752 = vmatpush1.bf16.msra.mxu1 %v1206_v40  ;;  %695 = vmatpush1.bf16.msra.mxu0 %v1196_v47 }
 0x155   :  { %753 = vmatprep.subr.bf16.mxu1 %v1199_v44  ;;  %696 = vmatprep.subr.bf16.mxu0 %v1189_v49  ;;  %v234_v44 = vsub.s32 4, %v1573_v3 }
 0x157   :  { %v235_v51 = vrot.slane %v1581_v5, %v234_v44 }
 0x158   :  { %754 = vmatpush1.bf16.msra.mxu1 %v1198_v50  ;;  %697 = vmatpush1.bf16.msra.mxu0 %v1188_v56  ;;  %v246_v50 = vsub.s32 7, %v1573_v3 }
 0x159   :  { %755 = vmatprep.subr.bf16.mxu1 %v1191_v53  ;;  %698 = vmatprep.subr.bf16.mxu0 %v1181_v57 }
 0x15a   :  { %v1668_v59 = vrot.slane %v1581_v5, %v246_v50 }
 0x15c   :  { %756 = vmatpush1.bf16.msra.mxu1 %v1190_v58  ;;  %699 = vmatpush1.bf16.msra.mxu0 %v1180_v0 }
 0x15d   :  { %757 = vmatprep.subr.bf16.mxu1 %v1183_v61  ;;  %700 = vmatprep.subr.bf16.mxu0 %v1173_v10  ;;  %v1671_v61 = vrot.slane %v830_v54, %v1576_v4 }
 0x160   :  { %758 = vmatpush1.bf16.msra.mxu1 %v1182_v11  ;;  %701 = vmatpush1.bf16.msra.mxu0 %v1172_v13  ;;  %v1678_v13 = vrot.slane %v830_v54, %v1584_v6 }
 0x161   :  { %759 = vmatprep.subr.bf16.mxu1 %v1175_v12  ;;  %v1675_v12 = vrot.slane %v830_v54, %v1587_v7 }
 0x163   :  { %719 = vmatmul.mubr.bf16.vlgmr.msra.gmra.mxu0 %v1566_v1 }
 0x164   :  { %760 = vmatpush1.bf16.msra.mxu1 %v1174_v14  ;;  %724 = vmatprep.mubr.bf16.mxu0 %v1484_v8 }
 0x167   :  { %778 = vmatmul.mubr.bf16.vlgmr.msra.gmra.mxu1 %v1566_v1  ;;  %v872_v1 = vstv %s831_s6 }
 0x168   :  { %1006 = vbcast.lane.b32.xlu0 %v1620_v48, 256  ;;  %783 = vmatprep.mubr.bf16.mxu1 %v1484_v8 }
 0x16b   :  { %725 = vmatmul.mubr.bf16.gmra.mxu0 %v1604_v21 }
 0x16c   :  { %734 = vmatprep.mubr.bf16.mxu0 %v1484_v8 }
 0x16f   :  { %784 = vmatmul.mubr.bf16.gmra.mxu1 %v1604_v21 }
 0x170   :  { %793 = vmatprep.mubr.bf16.mxu1 %v1484_v8  ;;  %v937_v8 = vld [vmem:[%s1723_s2] sm:$0x3]  ;;  %s1486_s2 = smov [#allocation15]  }
 0x171   :  { %vm940_vm1 = vcmp.eq.s32.totalorder %v937_v8, 0  ;;  %s1138_s29 = sshll.u32 %s1486_s2, 4  ;;  %s1139_s29 = int_to_ptr.vmem [resolvable:$true] %s1138_s29 }
 0x172   :  { %s1419_s1 = scalar_lea.vmem %s1139_s29, 32  ;;  %p1424_p8 = scmp.lt.s32.totalorder %s1139_s29, %s1139_s29 }
 0x173   :  { %735 = vmatmul.mubr.bf16.gmra.mxu0 %v1609_v35  ;;  %p1420_p7 = scmp.ne.s32.totalorder %s1139_s29, %s1419_s1  ;;  %p1425_p9 = scmp.lt.s32.totalorder %s1419_s1, %s1419_s1 }
 0x175   :  { %p1426_p10 = por %p1425_p9, %p1424_p8 }
 0x177   :  { %794 = vmatmul.mubr.bf16.gmra.mxu1 %v1609_v35  ;;  %p1427_p11 = pnand %p1426_p10, %p1420_p7 }
 0x1d7   :  { %v866_v16 = vpop.xlane.xlu0 %865 }
 0x1d8   :  { %v873_v18 = vadd.f32 %v872_v1, %v866_v16 }
 0x1da   :  { %v948_v21 = vrot.slane %v873_v18, %v1638_v17 }
 0x1db   :  { %v871_v19 = vpop.xlane.xlu0 %870 }
 0x1dc   :  { %v874_v20 = vadd.f32 %v872_v1, %v871_v19 }
 0x1de   :  { %v952_v22 = vrot.slane %v874_v20, %v1638_v17 }
 0x1e0   :  { %v954_v2 = vsel %vm953_vm0, %v952_v22, %v948_v21 }
 0x1e1   :  { %v1646_v23 = vsel %vm940_vm1, -1e+09, %v954_v2  ;;  %v891_v2 = vrot.slane %v830_v54, %v1590_v9 }
 0x1e2   :  { %v958_v24 = vsel %vm957_vm2, %v1646_v23, -inf  ;;  %1129 = vst.msk [vmem:[#allocation15] sm:$0x3] %vm957_vm2, %v1646_v23 }
 0x1e3   :  { %959 = vmax.xlane.f32.xlu1 %v958_v24 }
 0x1f4   :  { %1010 = vbcast.lane.b32.xlu1 %v1620_v48, 264  ;;  %v238_v48 = vsub.s32 5, %v1573_v3 }
 0x1f6   :  { %v1665_v56 = vrot.slane %v1581_v5, %v238_v48 }
 0x1f8   :  { %1017 = vbcast.lane.b32.xlu1 %v1655_v25, 256 }
 0x205   :  { %v620_v26 = vpop.f32.mrf.mxu0 }
 0x206   :  { %v675_v27 = vpop.f32.mrf.mxu1 }
 0x207   :  { %v621_v28 = vpop.f32.mrf.mxu0 }
 0x208   :  { %v676_v29 = vpop.f32.mrf.mxu1 }
 0x209   :  { %v622_v30 = vpop.f32.mrf.mxu0 }
 0x20a   :  { %v677_v31 = vpop.f32.mrf.mxu1 }
 0x20b   :  { %v623_v32 = vpop.f32.mrf.mxu0 }
 0x20c   :  { %v678_v33 = vpop.f32.mrf.mxu1 }
 0x20e   :  { %v626_v34 = vpop.f32.mrf.mxu0 }
 0x20f   :  { %v681_v35 = vpop.f32.mrf.mxu1 }
 0x210   :  { %v627_v36 = vpop.f32.mrf.mxu0 }
 0x211   :  { %v682_v37 = vpop.f32.mrf.mxu1 }
 0x212   :  { %v628_v38 = vpop.f32.mrf.mxu0 }
 0x213   :  { %v683_v39 = vpop.f32.mrf.mxu1 }
 0x214   :  { %v629_v40 = vpop.f32.mrf.mxu0 }
 0x215   :  { %v684_v42 = vpop.f32.mrf.mxu1 }
 0x223   :  { %v720_v41 = vpop.f32.mrf.mxu0 }
 0x225   :  { %v721_v45 = vpop.f32.mrf.mxu0 }
 0x227   :  { %v779_v43 = vpop.f32.mrf.mxu1  ;;  %v722_v49 = vpop.f32.mrf.mxu0 }
 0x229   :  { %v780_v47 = vpop.f32.mrf.mxu1  ;;  %v723_v53 = vpop.f32.mrf.mxu0 }
 0x22b   :  { %v781_v52 = vpop.f32.mrf.mxu1  ;;  %v726_v58 = vpop.f32.mrf.mxu0 }
 0x22c   :  { %v727_v60 = vadd.f32 %v726_v58, %v235_v51 }
 0x22d   :  { %v782_v57 = vpop.f32.mrf.mxu1  ;;  %v728_v63 = vpop.f32.mrf.mxu0 }
 0x22e   :  { %v812_v10 = vmax.f32 %v727_v60, 0.0  ;;  %v729_v11 = vadd.f32 %v728_v63, %v1665_v56 }
 0x22f   :  { %v785_v62 = vpop.f32.mrf.mxu1  ;;  %v730_v1 = vpop.f32.mrf.mxu0 }
 0x230   :  { %v786_v0 = vadd.f32 %v785_v62, %v243_v55  ;;  %v896_v18 = vmul.f32 %v1671_v61, %v812_v10  ;;  %v813_v19 = vmax.f32 %v729_v11, 0.0  ;;  %v731_v8 = vadd.f32 %v730_v1, %v235_v51 }
 0x231   :  { %v787_v14 = vpop.f32.mrf.mxu1  ;;  %v732_v21 = vpop.f32.mrf.mxu0 }
 0x232   :  { %v814_v5 = vmax.f32 %v786_v0, 0.0  ;;  %v788_v16 = vadd.f32 %v787_v14, %v1668_v59  ;;  %v897_v7 = vmul.f32 %v1675_v12, %v813_v19  ;;  %v816_v26 = vmax.f32 %v731_v8, 0.0 }
 0x233   :  { %v789_v20 = vpop.f32.mrf.mxu1  ;;  %v733_v27 = vadd.f32 %v732_v21, %v1665_v56  ;;  %v736_v29 = vpop.f32.mrf.mxu0 }
 0x234   :  { %v815_v22 = vmax.f32 %v788_v16, 0.0  ;;  %v790_v24 = vadd.f32 %v789_v20, %v243_v55  ;;  %v898_v6 = vmul.f32 %v1678_v13, %v814_v5  ;;  %v912_v32 = vadd.f32 %v897_v7, %v896_v18 }
 0x235   :  { %v791_v28 = vpop.f32.mrf.mxu1  ;;  %v900_v33 = vmul.f32 %v1671_v61, %v816_v26  ;;  %v817_v34 = vmax.f32 %v733_v27, 0.0  ;;  %v737_v35 = vadd.f32 %v736_v29, %v235_v51  ;;  %v738_v38 = vpop.f32.mrf.mxu0 }
 0x236   :  { %v818_v30 = vmax.f32 %v790_v24, 0.0  ;;  %v792_v31 = vadd.f32 %v791_v28, %v1668_v59  ;;  %v899_v9 = vmul.f32 %v891_v2, %v815_v22  ;;  %v739_v43 = vadd.f32 %v738_v38, %v1665_v56 }
 0x237   :  { %v795_v36 = vpop.f32.mrf.mxu1  ;;  %v901_v42 = vmul.f32 %v1675_v12, %v817_v34  ;;  %v820_v41 = vmax.f32 %v737_v35, 0.0  ;;  %v913_v45 = vadd.f32 %v912_v32, %v898_v6  ;;  %v740_v47 = vpop.f32.mrf.mxu0  ;;  %v1485_v32 = vmov 1966171168  }
 0x238   :  { %v902_v37 = vmul.f32 %v1678_v13, %v818_v30  ;;  %v819_v39 = vmax.f32 %v792_v31, 0.0  ;;  %v796_v40 = vadd.f32 %v795_v36, %v243_v55  ;;  %v821_v53 = vmax.f32 %v739_v43, 0.0 }
 0x239   :  { %v797_v44 = vpop.f32.mrf.mxu1  ;;  %v917_v50 = vadd.f32 %v901_v42, %v900_v33  ;;  %v904_v52 = vmul.f32 %v1671_v61, %v820_v41  ;;  %v741_v54 = vadd.f32 %v740_v47, %v235_v51  ;;  %v742_v60 = vpop.f32.mrf.mxu0  ;;  %v914_v0 = vadd.f32 %v913_v45, %v899_v9 }
 0x23a   :  { %v903_v46 = vmul.f32 %v891_v2, %v819_v39  ;;  %v822_v48 = vmax.f32 %v796_v40, 0.0  ;;  %v798_v49 = vadd.f32 %v797_v44, %v1668_v59  ;;  %v905_v10 = vmul.f32 %v1675_v12, %v821_v53  ;;  %v1007_v9 = vpop.permute.xlu0 %1006 }
 0x23b   :  { %v799_v57 = vpop.f32.mrf.mxu1  ;;  %v824_v11 = vmax.f32 %v741_v54, 0.0  ;;  %v743_v14 = vadd.f32 %v742_v60, %v1665_v56  ;;  %v918_v5 = vadd.f32 %v917_v50, %v902_v37  ;;  %915 = vadd.xlane.f32.xlu0 %v914_v0  ;;  %v1029_v33 = vunpack.c.l.s4 %v1485_v32 }
 0x23c   :  { %v906_v58 = vmul.f32 %v1678_v13, %v822_v48  ;;  %v823_v62 = vmax.f32 %v798_v49, 0.0  ;;  %v800_v63 = vadd.f32 %v799_v57, %v243_v55  ;;  %v922_v51 = vadd.f32 %v905_v10, %v904_v52 }
 0x23d   :  { %v801_v1 = vpop.f32.mrf.mxu1  ;;  %v908_v8 = vmul.f32 %v1671_v61, %v824_v11  ;;  %v825_v20 = vmax.f32 %v743_v14, 0.0  ;;  %v919_v21 = vadd.f32 %v918_v5, %v903_v46  ;;  %v1030_v34 = vunpack.c.0.s8 %v1029_v33 }
 0x23e   :  { %v907_v16 = vmul.f32 %v891_v2, %v823_v62  ;;  %v826_v18 = vmax.f32 %v800_v63, 0.0  ;;  %v802_v19 = vadd.f32 %v801_v1, %v1668_v59  ;;  %v923_v7 = vadd.f32 %v922_v51, %v906_v58 }
 0x23f   :  { %v909_v55 = vmul.f32 %v1675_v12, %v825_v20  ;;  %v1033_v35 = vsub.s32 %v1030_v34, %v1573_v3  ;;  %vm1023_vm3 = vcmp.eq.s32.totalorder %v1634_v15, %v1007_v9 }
 0x240   :  { %v827_v22 = vmax.f32 %v802_v19, 0.0  ;;  %v910_v24 = vmul.f32 %v1678_v13, %v826_v18  ;;  %v924_v6 = vadd.f32 %v923_v7, %v907_v16 }
 0x241   :  { %v927_v26 = vadd.f32 %v909_v55, %v908_v8 }
 0x242   :  { %v911_v56 = vmul.f32 %v891_v2, %v827_v22  ;;  %925 = vadd.xlane.f32.xlu0 %v924_v6 }
 0x243   :  { %v928_v27 = vadd.f32 %v927_v26, %v910_v24 }
 0x245   :  { %v929_v28 = vadd.f32 %v928_v27, %v911_v56 }
 0x247   :  { %930 = vadd.xlane.f32.xlu0 %v929_v28 }
 0x26c   :  { %v960_v59 = vpop.xlane.xlu1 %959 }
 0x26d   :  { %v961_v29 = vsub.f32 %v1646_v23, %v960_v59 }
 0x26f   :  { %v962_v30 = vmul.f32 1.442695, %v961_v29 }
 0x270   :  { %v1011_v12 = vpop.permute.xlu1 %1010 }
 0x271   :  { %1251 = vpow2.f32 %v962_v30  ;;  %vm1024_vm5 = vcmp.eq.s32.totalorder %v1634_v15, %v1011_v12 }
 0x274   :  { %v1018_v13 = vpop.permute.xlu1 %1017 }
 0x275   :  { %vm1025_vm7 = vcmp.eq.s32.totalorder %v1634_v15, %v1018_v13 }
 0x27e   :  { %v1252_v61 = vpop.eup %1251 }
 0x27f   :  { %v964_v31 = vsel %vm957_vm2, %v1252_v61, 0.0 }
 0x280   :  { %965 = vadd.xlane.f32.xlu1 %v964_v31 }
 0x291   :  { %1021 = vbcast.lane.b32.xlu1 %v1655_v25, 264 }
 0x2b5   :  { %920 = vadd.xlane.f32.xlu1 %v919_v21 }
 0x309   :  { %v966_v2 = vpop.xlane.xlu1 %965 }
 0x30a   :  { %1253 = vrcp.f32 %v966_v2 }
 0x30d   :  { %v1022_v38 = vpop.permute.xlu1 %1021 }
 0x30e   :  { %vm1026_vm6 = vcmp.eq.s32.totalorder %v1634_v15, %v1022_v38 }
 0x317   :  { %v1254_v36 = vpop.eup %1253 }
 0x318   :  { %v968_v23 = vmul.f32 %v1254_v36, %v1252_v61 }
 0x31a   :  { %v1034_v37 = vrot.slane %v968_v23, %v1033_v35 }
 0x31c   :  { %v1042_v39 = vrot.slane %v1034_v37, %v1033_v35  ;;  %v1035_v40 = vcombine.high %v1034_v37, %v1034_v37 }
 0x31e   :  { %v1053_v25 = vrot.slane %v1042_v39, %v1576_v4  ;;  %v1049_v42 = vrot.slane %v1035_v40, %v1033_v35 }
 0x320   :  { %v1061_v41 = vsel %vm1024_vm5, %v1053_v25, 0.0  ;;  %v1060_v43 = vsel %vm1023_vm3, %v1053_v25, 0.0  ;;  %v1057_v44 = vrot.slane %v1049_v42, %v1576_v4 }
 0x321   :  { %v1068_v45 = vsel %vm1064_vm4, %v1061_v41, 0.0  ;;  %v1065_v46 = vsel %vm1064_vm4, %v1060_v43, 0.0 }
 0x322   :  { %1069 = vadd.xlane.f32.xlu1 %v1068_v45  ;;  %1066 = vadd.xlane.f32.xlu0 %v1065_v46  ;;  %v1063_v47 = vsel %vm1026_vm6, %v1057_v44, 0.0  ;;  %v1062_v48 = vsel %vm1025_vm7, %v1057_v44, 0.0 }
 0x323   :  { %v1074_v49 = vsel %vm1064_vm4, %v1063_v47, 0.0  ;;  %v1071_v50 = vsel %vm1064_vm4, %v1062_v48, 0.0 }
 0x326   :  { %1075 = vadd.xlane.f32.xlu1 %v1074_v49  ;;  %1072 = vadd.xlane.f32.xlu0 %v1071_v50 }
 0x327   :  { %1430 = shalt.err (!%p1427_p11)
}
 0x328   :  { %1141 = dma.vmem_to_hbm [thread:$0]  %s1139_s29, 32, %s1730_s9, [#allocation4]   ;;  %v916_v4 = vpop.xlane.xlu0 %915  ;;  %v1110_v47 = vadd.s32 4294967288, %v1634_v15  ;;  %vm1115_vm8 = vcmask 130112   ;;  %vm1130_vm10 = vcmask 123904  }
 0x329   :  { %s1232_s4 = sld [smem:[#allocation14 + $0x1]]  ;;  %s1487_s9 = smov [#allocation16]  }
 0x32a   :  { %v1113_v50 = vsub.s32 %v1110_v47, %v1573_v3  ;;  %s1148_s12 = sshll.u32 %s1487_s9, 4  ;;  %s1149_s12 = int_to_ptr.vmem [resolvable:$true] %s1148_s12 }
 0x32b   :  { %s1439_s13 = scalar_lea.vmem %s1149_s12, 32  ;;  %p1444_p13 = scmp.lt.s32.totalorder %s1149_s12, %s1149_s12 }
 0x32c   :  { %v926_v52 = vpop.xlane.xlu0 %925  ;;  %p1440_p12 = scmp.ne.s32.totalorder %s1149_s12, %s1439_s13  ;;  %p1445_p0 = scmp.lt.s32.totalorder %s1439_s13, %s1439_s13 }
 0x32e   :  { %p1446_p1 = por %p1445_p0, %p1444_p13 }
 0x32f   :  { %v932_v53 = vstv %s1232_s4 }
 0x330   :  { %v933_v57 = vadd.f32 %v932_v53, %v916_v4  ;;  %v931_v60 = vpop.xlane.xlu0 %930  ;;  %v935_v63 = vadd.f32 %v932_v53, %v926_v52  ;;  %p1447_p2 = pnand %p1446_p1, %p1440_p12 }
 0x331   :  { %v936_v10 = vadd.f32 %v932_v53, %v931_v60 }
 0x332   :  { %v969_v62 = vsub.f32 0.0, %v933_v57  ;;  %v971_v14 = vsub.f32 0.0, %v935_v63  ;;  %v938_v63 = vld [vmem:[#allocation8] sm:$0x3] }
 0x333   :  { %v972_v5 = vsub.f32 0.0, %v936_v10  ;;  %vm1101_vm9 = vcmp.eq.s32.totalorder %v938_v63, 0 }
 0x334   :  { %v973_v11 = vmul.f32 1.442695, %v969_v62  ;;  %v977_v16 = vmul.f32 1.442695, %v971_v14 }
 0x335   :  { %v979_v18 = vmul.f32 1.442695, %v972_v5 }
 0x336   :  { %1255 = vpow2.f32 %v973_v11 }
 0x33e   :  { %v921_v54 = vpop.xlane.xlu1 %920 }
 0x33f   :  { %v934_v58 = vadd.f32 %v932_v53, %v921_v54 }
 0x341   :  { %v970_v0 = vsub.f32 0.0, %v934_v58 }
 0x343   :  { %v975_v1 = vmul.f32 1.442695, %v970_v0  ;;  %v1256_v19 = vpop.eup %1255 }
 0x344   :  { %v981_v8 = vadd.f32 1.0, %v1256_v19 }
 0x345   :  { %1257 = vpow2.f32 %v975_v1 }
 0x346   :  { %1259 = vpow2.f32 %v977_v16 }
 0x347   :  { %1261 = vpow2.f32 %v979_v18 }
 0x348   :  { %1263 = vrcp.f32 %v981_v8 }
 0x352   :  { %v1258_v51 = vpop.eup %1257 }
 0x353   :  { %v1260_v20 = vpop.eup %1259  ;;  %v982_v21 = vadd.f32 1.0, %v1258_v51 }
 0x354   :  { %v1262_v22 = vpop.eup %1261  ;;  %v983_v55 = vadd.f32 1.0, %v1260_v20 }
 0x355   :  { %1265 = vrcp.f32 %v982_v21  ;;  %v984_v24 = vadd.f32 1.0, %v1262_v22  ;;  %v1264_v7 = vpop.eup %1263 }
 0x356   :  { %1267 = vrcp.f32 %v983_v55  ;;  %v993_v56 = vmax.f32 %v1264_v7, 1e-07 }
 0x357   :  { %1269 = vrcp.f32 %v984_v24 }
 0x358   :  { %v997_v59 = vmin.f32 %v993_v56, 0.9999999 }
 0x362   :  { %v1266_v26 = vpop.eup %1265 }
 0x363   :  { %v1268_v6 = vpop.eup %1267  ;;  %v994_v27 = vmax.f32 %v1266_v26, 1e-07 }
 0x364   :  { %v1270_v28 = vpop.eup %1269  ;;  %v995_v61 = vmax.f32 %v1268_v6, 1e-07 }
 0x365   :  { %v998_v29 = vmin.f32 %v994_v27, 0.9999999  ;;  %v996_v30 = vmax.f32 %v1270_v28, 1e-07 }
 0x366   :  { %v999_v35 = vmin.f32 %v995_v61, 0.9999999 }
 0x367   :  { %v1000_v34 = vmin.f32 %v996_v30, 0.9999999 }
 0x3ab   :  { %v1070_v31 = vpop.xlane.xlu1 %1069  ;;  %v1067_v12 = vpop.xlane.xlu0 %1066 }
 0x3ac   :  { %v1078_v13 = vmul.f32 %v1070_v31, %v998_v29  ;;  %v1077_v2 = vmul.f32 %v1067_v12, %v997_v59 }
 0x3ae   :  { %v1082_v32 = vsub.f32 1.0, %v1078_v13  ;;  %v1081_v33 = vsub.f32 1.0, %v1077_v2 }
 0x3af   :  { %v1076_v36 = vpop.xlane.xlu1 %1075  ;;  %v1073_v23 = vpop.xlane.xlu0 %1072 }
 0x3b0   :  { %1271 = vrcp.f32 %v1082_v32  ;;  %v1080_v9 = vmul.f32 %v1076_v36, %v1000_v34  ;;  %v1079_v37 = vmul.f32 %v1073_v23, %v999_v35 }
 0x3b1   :  { %1273 = vrcp.f32 %v1081_v33 }
 0x3b2   :  { %v1084_v38 = vsub.f32 1.0, %v1080_v9  ;;  %v1083_v39 = vsub.f32 1.0, %v1079_v37 }
 0x3b4   :  { %1275 = vrcp.f32 %v1084_v38 }
 0x3b5   :  { %1277 = vrcp.f32 %v1083_v39 }
 0x3bd   :  { %v1272_v40 = vpop.eup %1271 }
 0x3be   :  { %v1274_v25 = vpop.eup %1273  ;;  %v1088_v42 = vmul.f32 %v1272_v40, %v1078_v13 }
 0x3bf   :  { %v1086_v41 = vmul.f32 %v1274_v25, %v1077_v2 }
 0x3c0   :  { %1279 = vlog2.f32 %v1088_v42 }
 0x3c1   :  { %v1276_v43 = vpop.eup %1275  ;;  %1281 = vlog2.f32 %v1086_v41 }
 0x3c2   :  { %v1278_v44 = vpop.eup %1277  ;;  %v1092_v45 = vmul.f32 %v1276_v43, %v1080_v9 }
 0x3c3   :  { %v1090_v46 = vmul.f32 %v1278_v44, %v1079_v37 }
 0x3c4   :  { %1283 = vlog2.f32 %v1092_v45 }
 0x3c5   :  { %1285 = vlog2.f32 %v1090_v46 }
 0x3cd   :  { %v1280_v48 = vpop.eup %1279 }
 0x3ce   :  { %v1282_v49 = vpop.eup %1281  ;;  %v1096_v4 = vmul.f32 0.6931472, %v1280_v48 }
 0x3cf   :  { %v1094_v52 = vmul.f32 0.6931472, %v1282_v49 }
 0x3d0   :  { %v1114_v58 = vrot.slane %v1096_v4, %v1113_v50 }
 0x3d1   :  { %v1284_v53 = vpop.eup %1283  ;;  %v1109_v60 = vrot.slane %v1094_v52, %v1638_v17 }
 0x3d2   :  { %v1286_v54 = vpop.eup %1285  ;;  %v1100_v57 = vmul.f32 0.6931472, %v1284_v53 }
 0x3d3   :  { %v1098_v62 = vmul.f32 0.6931472, %v1286_v54  ;;  %v1116_v15 = vsel %vm1115_vm8, %v1114_v58, %v1109_v60 }
 0x3d4   :  { %v1124_v0 = vrot.slane %v1100_v57, %v1113_v50 }
 0x3d5   :  { %v1120_v10 = vrot.slane %v1098_v62, %v1638_v17 }
 0x3d7   :  { %v1125_v11 = vsel %vm1115_vm8, %v1124_v0, %v1120_v10 }
 0x3d8   :  { %v1126_v3 = vsel %vm953_vm0, %v1125_v11, %v1116_v15 }
 0x3d9   :  { %v1128_v14 = vsel %vm1101_vm9, -1e+09, %v1126_v3 }
 0x3da   :  { %1131 = vst.msk [vmem:[#allocation16] sm:$0x3] %vm1130_vm10, %v1128_v14 }
 0x3db   :  { %1450 = shalt.err (!%p1447_p2)
}
 0x3dc   :  { %1151 = dma.vmem_to_hbm [thread:$0]  %s1149_s12, 32, %s1731_s10, [#allocation17]  }
 0x3dd   :  { %1469 = dma.done.wait [#allocation4], 32  }
 0x3de   :  { %1470 = vsyncadd [#allocation4], 4294967264 }
 0x3df   :  { %1471 = dma.done.wait [#allocation17], 32  }
 0x3e0   :  { %1472 = vsyncadd [#allocation17], 4294967264 }
 0x3e1   :  { %1158 = vsyncpa [#allocation3], 1 }
 0x3e2   :  { %1159 = vsyncpa [#allocation7], 1 }
 0x3e3   :  { %1160 = vsyncpa [#allocation10], 1 }
 0x3e4   :  { %1161 = vsyncpa [#allocation13], 1 }
 0x3e5   :  { %1162 = vsyncpa [#allocation4], 1 }
 0x3e6   :  { %1163 = vsyncpa [#allocation17], 1 }
 0x3e7   :  { %1164 = vsyncpa [#allocation5], 1 }

</bundles_post_ra>
